<compile_context>
chip_gen: v7x
topology: tpu7x:2x2x1
jax: 0.10.0
libtpu: 0.0.40
codegen_flags: <defaults>
</compile_context>

<pallas_src>
import functools

import jax
import jax.numpy as jnp
from jax.experimental import pallas as pl
from jax.experimental.pallas import tpu as pltpu


def _moving_avg_kernel(x_ref, o_ref, *, kernel_size: int, pad_left: int,
                       pad_right: int, feat: int):
    # x_ref / o_ref: (tile_rows, feat)
    xf = x_ref[...].astype(jnp.float32)
    rows = xf.shape[0]

    # In-kernel replication padding along the lane (feature) axis.
    parts = []
    if pad_left:
        parts.append(jnp.broadcast_to(xf[:, 0:1], (rows, pad_left)))
    parts.append(xf)
    if pad_right:
        parts.append(jnp.broadcast_to(xf[:, feat - 1:feat], (rows, pad_right)))
    xp = jnp.concatenate(parts, axis=1) if len(parts) > 1 else xf

    # Unrolled sliding-window sum: K static lane slices of the padded slab.
    # TODO(synk): for K >~ 32 switch to a running-sum / prefix-difference form so
    # the kernel stays HBM-bound instead of saturating the VALU/XLU slots.
    acc = xp[:, 0:feat]
    for k in range(1, kernel_size):
        acc = acc + xp[:, k:k + feat]

    o_ref[...] = (acc * (1.0 / kernel_size)).astype(o_ref.dtype)


def _round_up(n: int, m: int) -> int:
    return ((n + m - 1) // m) * m


def _choose_tile_rows(rows: int, feat: int, kernel_size: int,
                      vmem_budget_bytes: int) -> int:
    # Conservative per-row f32 working set: double-buffered input + output blocks
    # plus the in-kernel padded slab / accumulator temporaries (~8 copies).
    bytes_per_row = max(1, (feat + kernel_size - 1) * 4 * 8)
    cap = max(8, min(vmem_budget_bytes // bytes_per_row, 2048))
    cap -= cap % 8
    tile = min(cap, _round_up(rows, 8))
    # Keep at least 2 grid blocks when there is enough work, so the parallel rows
    # axis can be sharded across both TensorCores on v7x.
    if rows >= 16 and pl.cdiv(rows, tile) < 2:
        tile = max(8, _round_up(pl.cdiv(rows, 2), 8))
    return tile


def moving_average(x: jax.Array, kernel_size: int, *, tile_rows: int | None = None,
                   vmem_budget_bytes: int = 20 << 20) -> jax.Array:
    """x: [bs, seq_len, features] -> [bs, seq_len, features]"""
    bs, seq_len, feat = x.shape
    pad_left = (kernel_size - 1) // 2
    pad_right = kernel_size - 1 - pad_left

    rows = bs * seq_len
    x2d = x.reshape(rows, feat)  # contiguous reshape -> no extra HBM pass

    if tile_rows is None:
        tile_rows = _choose_tile_rows(rows, feat, kernel_size, vmem_budget_bytes)

    # TODO(synk): for feat << 128 a lane-dense layout (rows on the lane axis) would
    # avoid masked partial stores, but needs a physical transpose (2 extra HBM
    # passes) -- not worth it for a single-pass memory-bound op.
    # TODO(synk): for very large feat, block the feature axis with a K-1 halo
    # instead of keeping a full padded row per block (keeps tile_rows large on
    # v7x's 64 MiB VMEM).

    grid = (pl.cdiv(rows, tile_rows),)

    out2d = pl.pallas_call(
        functools.partial(_moving_avg_kernel, kernel_size=kernel_size,
                          pad_left=pad_left, pad_right=pad_right, feat=feat),
        out_shape=jax.ShapeDtypeStruct((rows, feat), x.dtype),
        grid_spec=pltpu.PrefetchScalarGridSpec(
            num_scalar_prefetch=0,
            grid=grid,
            in_specs=[pl.BlockSpec((tile_rows, feat), lambda i: (i, 0))],
            out_specs=pl.BlockSpec((tile_rows, feat), lambda i: (i, 0)),
        ),
        compiler_params=pltpu.CompilerParams(
            dimension_semantics=("parallel",),
        ),
    )(x2d)

    return out2d.reshape(bs, seq_len, feat)


def _reference(x: jax.Array, kernel_size: int) -> jax.Array:
    pad_left = (kernel_size - 1) // 2
    pad_right = kernel_size - 1 - pad_left
    xp = jnp.pad(x, ((0, 0), (0, 0), (pad_left, pad_right)), mode="edge")
    feat = x.shape[-1]
    windows = jnp.stack([xp[..., k:k + feat] for k in range(kernel_size)], axis=-1)
    return windows.mean(axis=-1)


if __name__ == "__main__":
    key = jax.random.PRNGKey(0)

    # Primary check: shapes matching the module's forward ([bs, seq_len, features]).
    bs, seq_len, feat = 2, 8, 16
    kernel_size = 5  # module hyperparameter; MovingAverage has no learnable params
    x = jax.random.normal(key, (bs, seq_len, feat), dtype=jnp.float32)

    y = jax.block_until_ready(moving_average(x, kernel_size))
    y_ref = _reference(x, kernel_size)
    assert y.shape == x.shape
    assert jnp.allclose(y, y_ref, atol=1e-5, rtol=1e-5)

    # Secondary check: ragged row count (rows % tile_rows != 0) + even kernel size.
    key2 = jax.random.PRNGKey(1)
    x2 = jax.random.normal(key2, (3, 7, 16), dtype=jnp.float32)
    y2 = jax.block_until_ready(moving_average(x2, 4))
    y2_ref = _reference(x2, 4)
    assert y2.shape == x2.shape
    assert jnp.allclose(y2, y2_ref, atol=1e-5, rtol=1e-5)

    print("KERNEL_OK")
</pallas_src>

<mosaic_0001>
module attributes {stable_mosaic.version = 11 : i64} {
  func.func @_moving_avg_kernel(%arg0: i32, %arg1: memref<8x16xf32, #tpu.memory_space<vmem>>, %arg2: memref<8x16xf32, #tpu.memory_space<vmem>>) attributes {dimension_semantics = [#tpu.dimension_semantics<parallel>], iteration_bounds = array<i64: 2>, scalar_prefetch = 0 : i64, scratch_operands = 0 : i64, tpu.core_type = #tpu.core_type<tc>, window_params = [{transform_indices = @transform_0, window_bounds = array<i64: 8, 16>}, {transform_indices = @transform_1, window_bounds = array<i64: 8, 16>}]} {
    %c0 = arith.constant 0 : index
    %c0_0 = arith.constant 0 : index
    %0 = vector.load %arg1[%c0, %c0_0] : memref<8x16xf32, #tpu.memory_space<vmem>>, vector<8x16xf32>
    %1 = vector.extract_strided_slice %0 {offsets = [0, 0], sizes = [8, 1], strides = [1, 1]} : vector<8x16xf32> to vector<8x1xf32>
    %2 = vector.shape_cast %1 : vector<8x1xf32> to vector<8x1xf32>
    %3 = vector.broadcast %2 : vector<8x1xf32> to vector<8x2xf32>
    %4 = vector.extract_strided_slice %0 {offsets = [0, 15], sizes = [8, 1], strides = [1, 1]} : vector<8x16xf32> to vector<8x1xf32>
    %5 = vector.shape_cast %4 : vector<8x1xf32> to vector<8x1xf32>
    %6 = vector.broadcast %5 : vector<8x1xf32> to vector<8x2xf32>
    %7 = tpu.concatenate %3, %0, %6 in 1 : vector<8x2xf32>, vector<8x16xf32>, vector<8x2xf32> -> vector<8x20xf32>
    %8 = vector.extract_strided_slice %7 {offsets = [0, 0], sizes = [8, 16], strides = [1, 1]} : vector<8x20xf32> to vector<8x16xf32>
    %9 = vector.extract_strided_slice %7 {offsets = [0, 1], sizes = [8, 16], strides = [1, 1]} : vector<8x20xf32> to vector<8x16xf32>
    %10 = arith.addf %8, %9 : vector<8x16xf32>
    %11 = vector.extract_strided_slice %7 {offsets = [0, 2], sizes = [8, 16], strides = [1, 1]} : vector<8x20xf32> to vector<8x16xf32>
    %12 = arith.addf %10, %11 : vector<8x16xf32>
    %13 = vector.extract_strided_slice %7 {offsets = [0, 3], sizes = [8, 16], strides = [1, 1]} : vector<8x20xf32> to vector<8x16xf32>
    %14 = arith.addf %12, %13 : vector<8x16xf32>
    %15 = vector.extract_strided_slice %7 {offsets = [0, 4], sizes = [8, 16], strides = [1, 1]} : vector<8x20xf32> to vector<8x16xf32>
    %16 = arith.addf %14, %15 : vector<8x16xf32>
    %cst = arith.constant 2.000000e-01 : f32
    %17 = vector.broadcast %cst : f32 to vector<8x16xf32>
    %18 = arith.mulf %16, %17 : vector<8x16xf32>
    %c0_1 = arith.constant 0 : index
    %c0_2 = arith.constant 0 : index
    %19 = vector.load %arg2[%c0_1, %c0_2] : memref<8x16xf32, #tpu.memory_space<vmem>>, vector<8x16xf32>
    tpu.vector_store %arg2[%c0_1, %c0_2], %18 {strides = array<i32>} : memref<8x16xf32, #tpu.memory_space<vmem>>, vector<8x16xf32>,
    return
  }
  func.func @transform_0(%arg0: i32) -> (i32, i32) {
    %c0_i32 = arith.constant 0 : i32
    %c0_i32_0 = arith.constant 0 : i32
    return %arg0, %c0_i32 : i32, i32
  }
  func.func @transform_1(%arg0: i32) -> (i32, i32) {
    %c0_i32 = arith.constant 0 : i32
    %c0_i32_0 = arith.constant 0 : i32
    return %arg0, %c0_i32 : i32, i32
  }
}

</mosaic_0001>

<bundles_post_ra>
// kernel: tpu_custom_call.1
= control target key start
LH: loop header
LB: loop body
LE: loop exit
PB: predicated region body
PF: predicated region fallthrough
CT: control target
= control target key end

     0   :  { %6 = vsyncpa [#allocation3], 0  ;;  %s602_s0 = inlined_call_operand.hbm [shape: f32[16,16], index: 0, kind: input, shape index: {}]   ;;  %s603_s1 = inlined_call_operand.hbm [shape: f32[16,16], index: 1, kind: output, shape index: {}]  }
   0x1   :  { %8 = vsyncpa [#allocation3 + $0x1], 0 }
   0x2   :  { %9 = vsyncpa [#allocation4], 0 }
   0x3   :  { %11 = vsyncpa [#allocation4 + $0x1], 0  ;;  %s437_s6 = smov 0   ;;  %s439_s7 = smov 0  }
   0x4   :  { %s441_s8 = smov 0   ;;  %s443_s9 = smov 0  }
   0x5 LB: > { %s458_s10 = sadd.s32 4294967295, %s416_s9   ;;  %s253_s11 = sadd.s32 4294967294, %s416_s9   ;;  %s416_s9 = sphi %s443_s9, %s618_s9   ;;  %s412_s8 = sphi %s441_s8, %s617_s8   ;;  %s408_s7 = sphi %s439_s7, %s616_s7   ;;  %s404_s6 = sphi %s437_s6, %s615_s6  }
   0x6   : > { %s462_s12 = sadd.s32 1, %s416_s9   ;;  %s24_s13 = sadd.s32 1, %s412_s8 }
   0x7   : > { %s21_s14 = ssub.s32 %s416_s9, %s462_s12  ;;  %p31_p0 = scmp.ne.s32.totalorder %s412_s8, %s408_s7 }
   0x8   : > { %p22_p1 = scmp.eq.s32.totalorder %s21_s14, 0  ;;  %p32_p2 = scmp.eq.s32.totalorder %s416_s9, 0 }
   0x9   : > { %p37_p3 = scmp.ne.s32.totalorder %s408_s7, %s404_s6  ;;  %p38_p4 = scmp.eq.s32.totalorder %s458_s10, 0 }
   0xa   : > { %s474_s15 = scalar_select %p22_p1, %s412_s8, %s24_s13  }
   0xb   : > { %p476_p5 = por %p32_p2, %p31_p0  ;;  %p480_p6 = por %p38_p4, %p37_p3 }
   0xc   : > { %p61_p7 = scmp.eq.s32.totalorder %s458_s10, 1  ;;  %p67_p8 = scmp.eq.s32.totalorder %s253_s11, 1 }
   0xd   : > { %p277_p10 = scmp.lt.s32.totalorder %s416_s9, 2  ;;  %s87_s20 = sand.u32 1, %s412_s8  }
   0xe   : > { %p487_p11 = por %p61_p7, %p31_p0  ;;  %p491_p12 = por %p67_p8, %p37_p3 }
   0xf   : > { %s257_s21 = sshll.u32 %s416_s9, 7  ;;  %s256_s22 = sshll.u32 %s87_s20, 3 }
  0x10   : > { %s607_s18 = scalar_select %p487_p11, 1, 0 }
  0x11   : > { %s608_s19 = scalar_select %p491_p12, 1, 0 }
  0x12   : > { %s500_s25 = scalar_lea.hbm %s602_s0, %s257_s21  ;;  %s91_s26 = scalar_lea.vmem [#allocation2], %s256_s22 }
  0x13   : > { %s98_s27 = sshll.u32 %s91_s26, 4  ;;  %p504_p13 = pnand %p277_p10, %p476_p5  ;;  %s508_s27 = int_to_ptr.vmem [resolvable:$true] %s98_s27 }
  0x14   : > { %s88_s29 = scalar_lea.sflag [#allocation3], %s87_s20  ;;  %s320_s30 = scalar_lea.hbm %s500_s25, 128 }
  0x15   : > { %p321_p2 = scmp.ne.s32.totalorder %s500_s25, %s320_s30  ;;  %p322_p3 = pneg %p504_p13 }
  0x16   : > { %s325_s4 = scalar_lea.hbm %s602_s0, 256  ;;  %p326_p5 = scmp.lt.u32.totalorder %s500_s25, %s602_s0 }
  0x17   : > { %p323_p4 = pnand %p322_p3, %p321_p2  ;;  %p327_p8 = scmp.lt.u32.totalorder %s325_s4, %s320_s30 }
  0x18   : > { %p329_p9 = scmp.lt.u32.totalorder %s320_s30, %s500_s25 }
  0x19   : > { %p324_p7 = pneg %p323_p4  ;;  %p328_p10 = por %p327_p8, %p326_p5 }
  0x1b   : > { %p330_p0 = por %p329_p9, %p328_p10 }
  0x1d   : > { %p331_p1 = pnand %p330_p0, %p324_p7 }
  0x1f   : > { %334 = shalt.err (!%p331_p1)
}
  0x20   : > { %s335_s13 = scalar_lea.vmem %s508_s27, 128  ;;  %s418_s14 = smov [#allocation2]  }
  0x21   : > { %p336_p2 = scmp.ne.s32.totalorder %s508_s27, %s335_s13  ;;  %s340_s16 = sshll.u32 %s418_s14, 4  ;;  %s341_s16 = int_to_ptr.vmem [resolvable:$false] %s340_s16 }
  0x22   : > { %s342_s20 = scalar_lea.vmem %s341_s16, 256  ;;  %p343_p11 = scmp.lt.s32.totalorder %s508_s27, %s341_s16 }
  0x23   : > { %p338_p4 = pnand %p336_p2, %p322_p3  ;;  %p344_p5 = scmp.lt.s32.totalorder %s342_s20, %s335_s13 }
  0x25   : > { %p339_p12 = pneg %p338_p4  ;;  %p345_p8 = por %p344_p5, %p343_p11 }
  0x27   : > { %p346_p9 = pnand %p345_p8, %p339_p12 }
  0x29   : > { %349 = shalt.err (!%p346_p9)
}
  0x2a   : > { %272 = dma.hbm_to_vmem [thread:$0]  (!%p504_p13), %s500_s25, 128, %s508_s27, %s88_s29  }
  0x2b   : > { %p610_p0 = scmp.lt.s32.totalorder %s416_s9, 3  ;;  %p611_p1 = scmp.ge.s32.totalorder %s416_s9, 1 }
  0x2d   : > { %p104_p3 = pnand %p611_p1, %p610_p0 }
  0x2e   : > { %s542_s21 = sand.u32 (!%p104_p3), 1, %s408_s7  }
  0x2f   : > { %107 = sbr.rel (%p104_p3) target bundleno = 332 (0x14c), region = 24  ;;  %s259_s22 = sshll.u32 (!%p104_p3), %s542_s21, 3 }
  0x30   : > { %s110_s23 = scalar_lea.sflag (!%p104_p3), [#allocation3], %s542_s21  ;;  %s113_s24 = scalar_lea.vmem (!%p104_p3), [#allocation2], %s259_s22 }
  0x36   : > { %395 = dma.done.wait (%p480_p6), %s110_s23, 128  }
  0x37   : > { %397 = vsyncadd (%p480_p6), %s110_s23, 4294967168  ;;  %v419_v0 = vmov 0   ;;  %v132_v1 = vld [vmem:[%s113_s24] sm:$0xff]  ;;  %s420_s25 = smov 2   ;;  %v421_v2 = vmov 15   ;;  %vm145_vm0 = vcmask 15360  }
  0x38   : > { %318 = vset.pattern.permute.xlu0 %v419_v0  ;;  %142 = vrot.lane.b32.xlu1 %v132_v1, %s420_s25  ;;  %vm147_vm1 = vcmask 146432   ;;  %s422_s26 = smov 125   ;;  %s423_s17 = smov 127   ;;  %vm167_vm2 = vcmask 130048  }
  0x39   : > { %135 = vperm.xlu0 %318, %v132_v1   ;;  %s424_s27 = smov 126   ;;  %s425_s28 = smov 124  }
  0x3a   : > { %s262_s29 = sshll.u32 %s458_s10, 7  ;;  %s131_s30 = scalar_lea.vmem [#allocation5], %s259_s22 }
  0x3b   : > { %s183_s2 = sshll.u32 %s131_s30, 4  ;;  %s558_s5 = scalar_lea.hbm %s603_s1, %s262_s29  ;;  %s560_s2 = int_to_ptr.vmem [resolvable:$true] %s183_s2 }
  0x3c   : > { %s170_s11 = scalar_lea.sflag [#allocation4], %s542_s21  ;;  %s350_s13 = scalar_lea.vmem %s560_s2, 128 }
  0x3d   : > { %319 = vset.pattern.permute.xlu0 %v421_v2  ;;  %p351_p6 = scmp.ne.s32.totalorder %s560_s2, %s350_s13  ;;  %p612_p11 = scmp.ne.s32.totalorder %s607_s18, 0 }
  0x3e   : > { %139 = vperm.xlu0 %319, %v132_v1   ;;  %s426_s10 = smov [#allocation5]  }
  0x3f   : > { %p352_p12 = pnand %p351_p6, %p612_p11  ;;  %s354_s14 = sshll.u32 %s426_s10, 4  ;;  %s355_s14 = int_to_ptr.vmem [resolvable:$false] %s354_s14 }
  0x40   : > { %s356_s16 = scalar_lea.vmem %s355_s14, 256  ;;  %p357_p7 = scmp.lt.s32.totalorder %s560_s2, %s355_s14 }
  0x41   : > { %p353_p13 = pneg %p352_p12  ;;  %p358_p10 = scmp.lt.s32.totalorder %s356_s16, %s350_s13 }
  0x43   : > { %p359_p2 = por %p358_p10, %p357_p7 }
  0x45   : > { %p360_p4 = pnand %p359_p2, %p353_p13 }
  0xaa   : > { %v143_v4 = vpop.permute.xlu1 %142 }
  0xb8   : > { %v136_v3 = vpop.permute.xlu0 %135 }
  0xb9   : > { %v146_v5 = vsel %vm145_vm0, %v136_v3, %v143_v4 }
  0xbd   : > { %v140_v6 = vpop.permute.xlu0 %139 }
  0xbe   : > { %v148_v7 = vsel %vm147_vm1, %v146_v5, %v140_v6 }
  0xbf   : > { %158 = vrot.lane.b32.xlu0 %v148_v7, %s422_s26  ;;  %150 = vrot.lane.b32.xlu1 %v148_v7, %s423_s17 }
  0xc3   : > { %154 = vrot.lane.b32.xlu1 %v148_v7, %s424_s27 }
  0xc7   : > { %162 = vrot.lane.b32.xlu1 %v148_v7, %s425_s28 }
 0x131   : > { %v151_v8 = vpop.permute.xlu1 %150  ;;  %v159_v12 = vpop.permute.xlu0 %158 }
 0x132   : > { %v153_v9 = vadd.f32 %v151_v8, %v148_v7 }
 0x135   : > { %v155_v10 = vpop.permute.xlu1 %154 }
 0x136   : > { %v157_v11 = vadd.f32 %v155_v10, %v153_v9 }
 0x138   : > { %v161_v13 = vadd.f32 %v159_v12, %v157_v11 }
 0x139   : > { %v163_v14 = vpop.permute.xlu1 %162 }
 0x13a   : > { %v165_v15 = vadd.f32 %v163_v14, %v161_v13 }
 0x13c   : > { %v166_v16 = vmul.f32 0.2, %v165_v15 }
 0x13e   : > { %168 = vst.msk [vmem:[%s131_s30] sm:$0xff] %vm167_vm2, %v166_v16 }
 0x13f   : > { %363 = shalt.err (!%p360_p4)
}
 0x140   : > { %s364_s20 = scalar_lea.hbm %s558_s5, 128  ;;  %s368_s23 = scalar_lea.hbm %s603_s1, 256 }
 0x141   : > { %p365_p5 = scmp.ne.s32.totalorder %s558_s5, %s364_s20  ;;  %p369_p0 = scmp.lt.u32.totalorder %s558_s5, %s603_s1 }
 0x142   : > { %p370_p1 = scmp.lt.u32.totalorder %s368_s23, %s364_s20  ;;  %p372_p6 = scmp.lt.u32.totalorder %s364_s20, %s558_s5 }
 0x143   : > { %p366_p8 = pnand %p365_p5, %p612_p11 }
 0x144   : > { %p371_p3 = por %p370_p1, %p369_p0 }
 0x145   : > { %p367_p9 = pneg %p366_p8 }
 0x146   : > { %p373_p12 = por %p372_p6, %p371_p3 }
 0x148   : > { %p374_p13 = pnand %p373_p12, %p367_p9 }
 0x14a   : > { %377 = shalt.err (!%p374_p13)
}
 0x14b   : > { %267 = dma.vmem_to_hbm [thread:$0]  (%p612_p11), %s560_s2, 128, %s558_s5, %s170_s11  }
 0x14c PF: > { %s195_s26 = sand.u32 1, %s404_s6   ;;  %p613_p7 = scmp.ne.s32.totalorder %s608_s19, 0 }
 0x14d   : > { %p614_p10 = scmp.ge.s32.totalorder %s416_s9, 2  ;;  %s196_s17 = scalar_lea.sflag [#allocation4], %s195_s26 }
 0x14f   : > { %p274_p2 = pnand %p614_p10, %p613_p7 }
 0x151   : > { %399 = dma.done.wait (!%p274_p2), %s196_s17, 128  }
 0x152   : > { %401 = vsyncadd (!%p274_p2), %s196_s17, 4294967168  ;;  %p14_p4 = scmp.ge.s32.totalorder %s462_s12, 4   ;;  %s615_s6 = smov %s408_s7 }
 0x153   : > { %s616_s7 = smov %s412_s8  ;;  %s617_s8 = smov %s474_s15 }
 0x154   : > { %s618_s9 = smov %s462_s12  ;;  %16 = sbr.rel (!%p14_p4) target bundleno = 5 (0x5), region = 69 }
 0x15b   :  { %201 = vsyncpa [#allocation3], 1 }
 0x15c   :  { %203 = vsyncpa [#allocation3 + $0x1], 1 }
 0x15d   :  { %204 = vsyncpa [#allocation4], 1 }
 0x15e   :  { %206 = vsyncpa [#allocation4 + $0x1], 1 }

</bundles_post_ra>
